<compile_context>
chip_gen: v7x
topology: tpu7x:2x2x1
jax: 0.10.0
libtpu: 0.0.40
codegen_flags: <defaults>
</compile_context>

<pallas_src>
import jax
import jax.numpy as jnp
from jax.experimental import pallas as pl
from jax.experimental.pallas import tpu as pltpu


def _upsample_scatter_kernel(onehot_ref, x_ref, o_ref):
    # onehot_ref: (K, S) in x's dtype — static scatter matrix, resident across grid.
    # x_ref     : (TILE_BC, K)        — current row tile of the down-sampled input.
    # o_ref     : (TILE_BC, S) f32    — zero-padded, scattered output tile.
    o_ref[...] = jnp.dot(
        x_ref[...], onehot_ref[...], preferred_element_type=jnp.float32
    ).astype(o_ref.dtype)


def _pick_tile_bc(bc, k, s, x_itemsize, out_itemsize, vmem_budget_bytes):
    """Largest row tile (aligned to sublane packing) fitting the VMEM budget."""
    # Sublane alignment: 8 rows for 32-bit, 16 for 16-bit, 32 for 8-bit inputs.
    row_align = max(8, 32 // int(x_itemsize))
    onehot_bytes = 2 * k * s * x_itemsize              # count double-buffered (safe)
    per_row = 2 * k * x_itemsize + 2 * s * out_itemsize  # double-buffered in + out
    avail = max(vmem_budget_bytes - onehot_bytes, row_align * per_row)
    tile = int(avail // per_row)
    tile = max(row_align, min(1024, (tile // row_align) * row_align))
    bc_pad = ((bc + row_align - 1) // row_align) * row_align
    return int(min(tile, bc_pad))


def upsample_output(x, attention_output, idx, *, vmem_budget_bytes=12 * 1024 * 1024):
    """x: [B, C, K]; attention_output: [B, C, S] (only its shape is used);
    idx: length-K int vector of target positions along the last axis.

    Returns float32 [B, C, S] with out[:, :, idx] = x (cast to f32), zeros elsewhere.
    """
    B, C, K = x.shape
    S = attention_output.shape[-1]
    BC = B * C
    out_dtype = jnp.float32

    x2d = x.reshape(BC, K)

    # Static one-hot scatter matrix [K, S] in x's dtype (0/1 are exact in bf16;
    # accumulation is f32 on the MXU, so selection is exact).
    idx = jnp.asarray(idx, dtype=jnp.int32)
    onehot = (idx[:, None] == jnp.arange(S, dtype=jnp.int32)[None, :]).astype(x.dtype)

    x_bytes = jnp.dtype(x.dtype).itemsize
    o_bytes = jnp.dtype(out_dtype).itemsize
    tile_bc = _pick_tile_bc(BC, K, S, x_bytes, o_bytes, vmem_budget_bytes)

    grid = (pl.cdiv(BC, tile_bc),)

    out2d = pl.pallas_call(
        _upsample_scatter_kernel,
        out_shape=jax.ShapeDtypeStruct((BC, S), out_dtype),
        grid=grid,
        in_specs=[
            # Scatter matrix: constant block index -> stays VMEM-resident.
            pl.BlockSpec((K, S), lambda i: (0, 0)),
            # Input rows: streamed HBM->VMEM with double-buffering.
            pl.BlockSpec((tile_bc, K), lambda i: (i, 0)),
        ],
        out_specs=pl.BlockSpec((tile_bc, S), lambda i: (i, 0)),
        compiler_params=pltpu.CompilerParams(
            dimension_semantics=("parallel",),      # shard rows across v7x's 2 TCs
            vmem_limit_bytes=32 * 1024 * 1024,
        ),
        cost_estimate=pl.CostEstimate(
            flops=2 * BC * K * S,
            transcendentals=0,
            bytes_accessed=BC * K * x_bytes + BC * S * o_bytes + K * S * x_bytes,
        ),
    )(onehot, x2d)

    return out2d.reshape(B, C, S)


if __name__ == "__main__":
    key = jax.random.PRNGKey(0)

    # Small shapes consistent with the forward: x is the down-sampled activation
    # [B, C, K]; attention_output provides the target shape [B, C, S].
    B, C, S = 2, 4, 16
    idx = jnp.array([0, 2, 5, 7, 8, 11, 13, 15], dtype=jnp.int32)  # static module param
    K = int(idx.shape[0])

    k1, k2 = jax.random.split(key)
    x = jax.random.normal(k1, (B, C, K), dtype=jnp.bfloat16)       # native-dtype MXU path
    attention_output = jax.random.normal(k2, (B, C, S), dtype=jnp.float32)

    out = jax.block_until_ready(upsample_output(x, attention_output, idx))

    # Reference: exact PyTorch semantics of
    #   out = zeros(attention_output.shape); out[:, :, idx] = x.float()
    ref = jnp.zeros((B, C, S), jnp.float32).at[:, :, idx].set(x.astype(jnp.float32))

    assert out.shape == (B, C, S)
    assert out.dtype == jnp.float32
    assert jnp.allclose(out, ref, atol=1e-6), "mismatch vs reference scatter"

    # TODO(synk): the module's .to('cuda:0') device placement has no kernel-level
    # equivalent; device placement is left to the surrounding JAX program.
    print("KERNEL_OK")
</pallas_src>

<mosaic_0001>
module attributes {stable_mosaic.version = 11 : i64} {
  func.func @_upsample_scatter_kernel(%arg0: i32, %arg1: memref<8x16xbf16, #tpu.memory_space<vmem>>, %arg2: memref<16x8xbf16, #tpu.memory_space<vmem>>, %arg3: memref<16x16xf32, #tpu.memory_space<vmem>>) attributes {dimension_semantics = [#tpu.dimension_semantics<parallel>], iteration_bounds = array<i64: 1>, scalar_prefetch = 0 : i64, scratch_operands = 0 : i64, tpu.core_type = #tpu.core_type<tc>, window_params = [{pipeline_mode = #tpu.pipeline_mode<synchronous>, transform_indices = @transform_0, window_bounds = array<i64: 8, 16>}, {transform_indices = @transform_1, window_bounds = array<i64: 16, 8>}, {transform_indices = @transform_2, window_bounds = array<i64: 16, 16>}]} {
    %c0 = arith.constant 0 : index
    %c0_0 = arith.constant 0 : index
    %0 = vector.load %arg2[%c0, %c0_0] : memref<16x8xbf16, #tpu.memory_space<vmem>>, vector<16x8xbf16>
    %c0_1 = arith.constant 0 : index
    %c0_2 = arith.constant 0 : index
    %1 = vector.load %arg1[%c0_1, %c0_2] : memref<8x16xbf16, #tpu.memory_space<vmem>>, vector<8x16xbf16>
    %cst = arith.constant dense<0.000000e+00> : vector<16x16xf32>
    %2 = tpu.matmul %0, %1, %cst {dimension_numbers = #tpu.dot_dimension_numbers<[1], [0], [0], [1], [0, 0, 1, 1], [], []>} : vector<16x8xbf16>, vector<8x16xbf16>, vector<16x16xf32> -> vector<16x16xf32>
    %c0_3 = arith.constant 0 : index
    %c0_4 = arith.constant 0 : index
    %3 = vector.load %arg3[%c0_3, %c0_4] : memref<16x16xf32, #tpu.memory_space<vmem>>, vector<16x16xf32>
    tpu.vector_store %arg3[%c0_3, %c0_4], %2 {strides = array<i32>} : memref<16x16xf32, #tpu.memory_space<vmem>>, vector<16x16xf32>,
    return
  }
  func.func @transform_0(%arg0: i32) -> (i32, i32) {
    %c0_i32 = arith.constant 0 : i32
    %c0_i32_0 = arith.constant 0 : i32
    %c0_i32_1 = arith.constant 0 : i32
    return %c0_i32, %c0_i32_0 : i32, i32
  }
  func.func @transform_1(%arg0: i32) -> (i32, i32) {
    %c0_i32 = arith.constant 0 : i32
    %c0_i32_0 = arith.constant 0 : i32
    return %arg0, %c0_i32 : i32, i32
  }
  func.func @transform_2(%arg0: i32) -> (i32, i32) {
    %c0_i32 = arith.constant 0 : i32
    %c0_i32_0 = arith.constant 0 : i32
    return %arg0, %c0_i32 : i32, i32
  }
}

</mosaic_0001>

<bundles_post_ra>
// kernel: tpu_custom_call.1
= control target key start
LH: loop header
LB: loop body
LE: loop exit
PB: predicated region body
PF: predicated region fallthrough
CT: control target
= control target key end

     0   :  { %7 = vsyncpa [#allocation3], 0  ;;  %s269_s0 = inlined_call_operand.hbm [shape: bf16[8,16], index: 0, kind: input, shape index: {}]   ;;  %s270_s1 = inlined_call_operand.hbm [shape: bf16[8,8], index: 1, kind: input, shape index: {}]   ;;  %s271_s2 = inlined_call_operand.hbm [shape: f32[8,16], index: 2, kind: output, shape index: {}]  }
   0x1   :  { %8 = vsyncpa [#allocation6], 0 }
   0x2   :  { %9 = vsyncpa [#allocation4], 0  ;;  %s209_s9 = smov [#allocation2]   ;;  %s137_s13 = scalar_lea.hbm %s269_s0, 64 }
   0x3   :  { %s16_s10 = sshll.u32 %s209_s9, 4  ;;  %p138_p0 = scmp.ne.s32.totalorder %s269_s0, %s137_s13  ;;  %s17_s10 = int_to_ptr.vmem [resolvable:$true] %s16_s10 }
   0x4   :  { %p141_p1 = scmp.lt.u32.totalorder %s137_s13, %s269_s0 }
   0x6   :  { %p143_p2 = pnand %p141_p1, %p138_p0 }
   0x8   :  { %146 = shalt.err (!%p143_p2)
}
   0x9   :  { %s147_s18 = scalar_lea.vmem %s17_s10, 64  ;;  %p152_p4 = scmp.lt.s32.totalorder %s17_s10, %s17_s10 }
   0xa   :  { %p148_p3 = scmp.ne.s32.totalorder %s17_s10, %s147_s18  ;;  %p153_p5 = scmp.lt.s32.totalorder %s147_s18, %s147_s18 }
   0xc   :  { %p154_p6 = por %p153_p5, %p152_p4 }
   0xe   :  { %p155_p7 = pnand %p154_p6, %p148_p3 }
  0x10   :  { %158 = shalt.err (!%p155_p7)
}
  0x11   :  { %19 = dma.hbm_to_vmem [thread:$0]  %s269_s0, 64, %s17_s10, [#allocation3]  }
  0x12   :  { %24 = vsyncadd [#allocation6], 64  ;;  %s210_s21 = smov [#allocation5]   ;;  %s159_s25 = scalar_lea.hbm %s270_s1, 64 }
  0x13   :  { %s25_s22 = sshll.u32 %s210_s21, 4  ;;  %p160_p8 = scmp.ne.s32.totalorder %s270_s1, %s159_s25  ;;  %s26_s22 = int_to_ptr.vmem [resolvable:$true] %s25_s22 }
  0x14   :  { %p163_p9 = scmp.lt.u32.totalorder %s159_s25, %s270_s1 }
  0x16   :  { %p165_p10 = pnand %p163_p9, %p160_p8 }
  0x18   :  { %168 = shalt.err (!%p165_p10)
}
  0x19   :  { %s169_s30 = scalar_lea.vmem %s26_s22, 64  ;;  %s173_s0 = scalar_lea.vmem %s26_s22, 128 }
  0x1a   :  { %p170_p11 = scmp.ne.s32.totalorder %s26_s22, %s169_s30  ;;  %p174_p12 = scmp.lt.s32.totalorder %s26_s22, %s26_s22 }
  0x1b   :  { %p175_p13 = scmp.lt.s32.totalorder %s173_s0, %s169_s30 }
  0x1d   :  { %p176_p0 = por %p175_p13, %p174_p12 }
  0x1f   :  { %p177_p1 = pnand %p176_p0, %p170_p11 }
  0x21   :  { %180 = shalt.err (!%p177_p1)
}
  0x22   :  { %s211_s3 = smov 64   ;;  %s212_s4 = smov 4  }
  0x23   :  { %31 = dma.hbm_to_vmem [thread:$0]  %s270_s1, 64, %s26_s22, [#allocation6], %s211_s3, %s211_s3, %s212_s4  }
  0x24   :  { %203 = dma.done.wait [#allocation3], 64  }
  0x25   :  { %204 = vsyncadd [#allocation3], 4294967232 }
  0x26   :  { %205 = dma.done.wait [#allocation6], 128  }
  0x27   :  { %206 = vsyncadd [#allocation6], 4294967168  ;;  %v213_v0 = vmov 0.0   ;;  %vm214_vm0 = vmmov 0   ;;  %vm51_vm1 = vcmask 1043456   ;;  %v136_v3 = vld [vmem:[#allocation5] sm:$0xff]  }
  0x28   :  { %121 = vmatprep.subr.bf16.mxu0 %v213_v0  ;;  %123 = vmatprep.mubr.msk.bf16.mxu0 %vm214_vm0, %v213_v0  ;;  %v41_v1 = vld [vmem:[#allocation2] sm:$0xf]  ;;  %vm47_vm2 = vcmask 64512   ;;  %vm96_vm3 = vcmask 130048  }
  0x29   :  { %v53_v2 = vsel %vm51_vm1, %v41_v1, 0 }
  0x2a   :  { %122 = vmatpush3.bf16.msra.mxu0 %v53_v2 }
  0x2d   :  { %124 = vmatmul.mubr.msk.bf16.vlgmr.msra.gmra.mrb[0].mxu0 %vm47_vm2, %v136_v3 }
 0x100   :  { %v89_v4 = vpop.f32.mrb[0].mxu0 }
 0x101   :  { %97 = vst.msk [vmem:[#allocation7] sm:$0xff] %vm96_vm3, %v89_v4  ;;  %v125_v5 = vpop.f32.mrb[1].mxu0 }
 0x102   :  { %v92_v6 = vpop.f32.mrb[2].mxu0 }
 0x103   :  { %98 = vst.msk [vmem:[#allocation7 + $0x8] sm:$0xff] %vm96_vm3, %v92_v6  ;;  %v126_v7 = vpop.f32.mrb[3].mxu0 }
 0x104   :  { %103 = vsyncadd [#allocation4], 128  ;;  %s215_s1 = smov [#allocation7]  }
 0x105   :  { %s104_s7 = sshll.u32 %s215_s1, 4  ;;  %s105_s7 = int_to_ptr.vmem [resolvable:$true] %s104_s7 }
 0x106   :  { %s181_s8 = scalar_lea.vmem %s105_s7, 128  ;;  %s185_s9 = scalar_lea.vmem %s105_s7, 256 }
 0x107   :  { %p182_p2 = scmp.ne.s32.totalorder %s105_s7, %s181_s8  ;;  %p186_p3 = scmp.lt.s32.totalorder %s105_s7, %s105_s7 }
 0x108   :  { %p187_p4 = scmp.lt.s32.totalorder %s185_s9, %s181_s8 }
 0x10a   :  { %p188_p5 = por %p187_p4, %p186_p3 }
 0x10c   :  { %p189_p6 = pnand %p188_p5, %p182_p2 }
 0x10e   :  { %192 = shalt.err (!%p189_p6)
}
 0x10f   :  { %s193_s12 = scalar_lea.hbm %s271_s2, 128 }
 0x110   :  { %p194_p7 = scmp.ne.s32.totalorder %s271_s2, %s193_s12  ;;  %p197_p8 = scmp.lt.u32.totalorder %s193_s12, %s271_s2 }
 0x112   :  { %p199_p9 = pnand %p197_p8, %p194_p7 }
 0x114   :  { %202 = shalt.err (!%p199_p9)
}
 0x115   :  { %s216_s17 = smov 128   ;;  %s217_s18 = smov 8  }
 0x116   :  { %110 = dma.vmem_to_hbm [thread:$0]  %s105_s7, 128, %s271_s2, [#allocation4], %s216_s17, %s216_s17, %s217_s18  }
 0x117   :  { %207 = dma.done.wait [#allocation4], 256  }
 0x118   :  { %208 = vsyncadd [#allocation4], 4294967040 }
 0x119   :  { %114 = vsyncpa [#allocation3], 1 }
 0x11a   :  { %115 = vsyncpa [#allocation6], 1 }
 0x11b   :  { %116 = vsyncpa [#allocation4], 1 }

</bundles_post_ra>
